<compile_context>
chip_gen: v7x
topology: tpu7x:2x2x1
jax: 0.10.0
libtpu: 0.0.40
codegen_flags: <defaults>
</compile_context>

<pallas_src>
import itertools
from typing import Callable, List, Optional

import jax
import jax.numpy as jnp
from jax.experimental import pallas as pl
from jax.experimental.pallas import tpu as pltpu

# Cap on simultaneously in-flight DMA descriptors inside the kernel.
_MAX_OUTSTANDING_DMAS = 16


def _make_a2a_dma_kernel(dim_sum_per_rank: List[int]):
    """Builds the pure-DMA all-to-all kernel body (one big copy per source)."""
    world_size = len(dim_sum_per_rank)
    offsets = [0] + list(itertools.accumulate(dim_sum_per_rank))

    def kernel(*refs):
        # refs = (emb_hbm_src0, ..., emb_hbm_src{W-1}, out_hbm, dma_sems)
        emb_refs = refs[:world_size]
        out_ref = refs[world_size]
        sem = refs[world_size + 1]

        # One HBM->HBM copy per source rank: (W, B_local, D_s) -> out[:,:,lo:hi].
        # Issue everything up-front (up to _MAX_OUTSTANDING_DMAS in flight),
        # wait on all of them only at the end.
        copies = []
        for s in range(world_size):                 # static unroll over sources
            lo, hi = offsets[s], offsets[s + 1]
            cp = pltpu.make_async_copy(
                emb_refs[s],                        # whole (W, B_local, D_s) slab
                out_ref.at[:, :, lo:hi],            # feature slot of every dest
                sem.at[s],
            )
            cp.start()
            copies.append(cp)
            if s >= _MAX_OUTSTANDING_DMAS:
                copies[s - _MAX_OUTSTANDING_DMAS].wait()
        for cp in copies[max(0, world_size - _MAX_OUTSTANDING_DMAS):]:
            cp.wait()

    return kernel


def alltoall_pooled_sim(local_embs_per_rank: List[jax.Array],
                        dim_sum_per_rank: List[int]) -> jax.Array:
    """Simulated alltoall_pooled for all ranks at once (HBM->HBM DMA kernel).

    Args:
      local_embs_per_rank: list (len = world_size) of (B_global, D_r) arrays.
      dim_sum_per_rank:    list of feature dims D_r per rank.

    Returns:
      (world_size, B_local, sum(dim_sum_per_rank)) array; entry [d] is the
      output tensor that rank d would receive.
    """
    world_size = len(local_embs_per_rank)
    assert world_size == len(dim_sum_per_rank)
    B_global = local_embs_per_rank[0].shape[0]
    assert B_global % world_size == 0, (
        f"num of ranks {world_size} doesn't divide global batch size {B_global}")
    B_local = B_global // world_size
    D_total = sum(dim_sum_per_rank)
    dtype = local_embs_per_rank[0].dtype
    # DMA copies do not cast; require a single dtype across ranks.
    assert all(e.dtype == dtype for e in local_embs_per_rank), (
        "all ranks' local_embs must share one dtype")
    dtype_bytes = jnp.dtype(dtype).itemsize

    # Free, contiguous reshape in the wrapper: (B_global, D_s) ->
    # (world_size, B_local, D_s).  Lets the kernel move each source with a
    # single large DMA instead of W small per-destination ones.
    embs_reshaped = [
        e.reshape(world_size, B_local, dim_sum_per_rank[s])
        for s, e in enumerate(local_embs_per_rank)
    ]

    kernel = _make_a2a_dma_kernel(dim_sum_per_rank)

    out = pl.pallas_call(
        kernel,
        out_shape=jax.ShapeDtypeStruct((world_size, B_local, D_total), dtype),
        # No grid: one kernel invocation issues all W copies.
        in_specs=[pl.BlockSpec(memory_space=pl.ANY)] * world_size,
        out_specs=pl.BlockSpec(memory_space=pl.ANY),
        scratch_shapes=[pltpu.SemaphoreType.DMA((world_size,))],
        compiler_params=pltpu.CompilerParams(
            has_side_effects=True,               # output written via DMA, keep it
        ),
        cost_estimate=pl.CostEstimate(
            flops=0,
            transcendentals=0,
            bytes_accessed=2 * world_size * B_local * D_total * dtype_bytes),
    )(*embs_reshaped)
    return out


class PooledEmbeddingsAwaitable:
    """Mimics torchrec's awaitable: wait() returns the tensor after callbacks."""

    def __init__(self, tensor: jax.Array,
                 callbacks: List[Callable[[jax.Array], jax.Array]]) -> None:
        self._tensor = tensor
        self._callbacks = callbacks

    def wait(self) -> jax.Array:
        ret = self._tensor
        for cb in self._callbacks:
            ret = cb(ret)
        return ret

    @property
    def callbacks(self):
        return self._callbacks


class PooledEmbeddingsAllToAll:
    """JAX/Pallas port of torchrec PooledEmbeddingsAllToAll (single-host sim)."""

    def __init__(self, world_size: int, dim_sum_per_rank: List[int],
                 callbacks: Optional[List[Callable]] = None) -> None:
        self._world_size = world_size
        self._dim_sum_per_rank = dim_sum_per_rank
        self._callbacks: List[Callable] = list(callbacks) if callbacks else []
        # Deterministic "registered buffers" (no checkpoint load).
        self._dim_sum_per_rank_tensor = jnp.asarray(dim_sum_per_rank, jnp.int32)
        self._cumsum_dim_sum_per_rank_tensor = jnp.asarray(
            list(itertools.accumulate(dim_sum_per_rank)), jnp.int32)

    def forward(self, local_embs_per_rank: List[jax.Array],
                batch_size_per_rank: Optional[List[int]] = None
                ) -> PooledEmbeddingsAwaitable:
        if batch_size_per_rank is not None:
            # TODO(synk): variable batch_size_per_rank (ragged row slabs) not
            # implemented; only the uniform-batch path is supported here.
            raise NotImplementedError
        B_global = local_embs_per_rank[0].shape[0]
        assert B_global % self._world_size == 0
        out = alltoall_pooled_sim(local_embs_per_rank, self._dim_sum_per_rank)
        return PooledEmbeddingsAwaitable(out, self._callbacks)

    __call__ = forward

    @property
    def callbacks(self):
        return self._callbacks


def _reference(local_embs_per_rank, world_size):
    B_global = local_embs_per_rank[0].shape[0]
    B_local = B_global // world_size
    outs = []
    for d in range(world_size):
        outs.append(jnp.concatenate(
            [e[d * B_local:(d + 1) * B_local, :] for e in local_embs_per_rank],
            axis=1))
    return jnp.stack(outs, axis=0)


if __name__ == "__main__":
    world_size = 2
    dim_sum_per_rank = [128, 256]   # features held on each rank
    B_local = 8
    B_global = world_size * B_local

    key = jax.random.PRNGKey(0)
    keys = jax.random.split(key, world_size)
    local_embs_per_rank = [
        jax.random.normal(keys[r], (B_global, dim_sum_per_rank[r]), jnp.float32)
        for r in range(world_size)
    ]

    a2a = PooledEmbeddingsAllToAll(world_size, dim_sum_per_rank)
    result = a2a(local_embs_per_rank).wait()
    result = jax.block_until_ready(result)

    ref = _reference(local_embs_per_rank, world_size)
    assert result.shape == (world_size, B_local, sum(dim_sum_per_rank))
    assert jnp.allclose(result, ref), "mismatch vs reference"

    print("KERNEL_OK")
</pallas_src>

<mosaic_0001>
module attributes {stable_mosaic.version = 11 : i64} {
  func.func @kernel(%arg0: memref<2x8x128xf32, #tpu.memory_space<any>>, %arg1: memref<2x8x256xf32, #tpu.memory_space<any>>, %arg2: memref<2x8x384xf32, #tpu.memory_space<any>>, %arg3: memref<2x!tpu.dma_semaphore, #tpu.memory_space<semaphore_mem>>) attributes {dimension_semantics = [], scalar_prefetch = 0 : i64, scratch_operands = 1 : i64, tpu.core_type = #tpu.core_type<tc>} {
    %c0_i32 = arith.constant 0 : i32
    %c0_i32_0 = arith.constant 0 : i32
    %c0_i32_1 = arith.constant 0 : i32
    %c0_i32_2 = arith.constant 0 : i32
    %0 = tpu.memref_slice %arg2[%c0_i32_0, %c0_i32_1, %c0_i32_2] : memref<2x8x384xf32, #tpu.memory_space<any>> -> memref<2x8x128xf32, #tpu.memory_space<any>>
    %1 = tpu.memref_slice %arg3[%c0_i32] : memref<2x!tpu.dma_semaphore, #tpu.memory_space<semaphore_mem>> -> memref<1x!tpu.dma_semaphore, #tpu.memory_space<semaphore_mem>>
    %2 = tpu.memref_squeeze %1 : memref<1x!tpu.dma_semaphore, #tpu.memory_space<semaphore_mem>> -> memref<!tpu.dma_semaphore, #tpu.memory_space<semaphore_mem>>
    tpu.enqueue_dma source(%arg0 : memref<2x8x128xf32, #tpu.memory_space<any>>) target(%0 : memref<2x8x128xf32, #tpu.memory_space<any>>) target_semaphore(%2 : memref<!tpu.dma_semaphore, #tpu.memory_space<semaphore_mem>>)
    %c1_i32 = arith.constant 1 : i32
    %c0_i32_3 = arith.constant 0 : i32
    %c0_i32_4 = arith.constant 0 : i32
    %c128_i32 = arith.constant 128 : i32
    %3 = tpu.memref_slice %arg2[%c0_i32_3, %c0_i32_4, %c128_i32] : memref<2x8x384xf32, #tpu.memory_space<any>> -> memref<2x8x256xf32, #tpu.memory_space<any>>
    %4 = tpu.memref_slice %arg3[%c1_i32] : memref<2x!tpu.dma_semaphore, #tpu.memory_space<semaphore_mem>> -> memref<1x!tpu.dma_semaphore, #tpu.memory_space<semaphore_mem>>
    %5 = tpu.memref_squeeze %4 : memref<1x!tpu.dma_semaphore, #tpu.memory_space<semaphore_mem>> -> memref<!tpu.dma_semaphore, #tpu.memory_space<semaphore_mem>>
    tpu.enqueue_dma source(%arg1 : memref<2x8x256xf32, #tpu.memory_space<any>>) target(%3 : memref<2x8x256xf32, #tpu.memory_space<any>>) target_semaphore(%5 : memref<!tpu.dma_semaphore, #tpu.memory_space<semaphore_mem>>)
    %c0_i32_5 = arith.constant 0 : i32
    %c0_i32_6 = arith.constant 0 : i32
    %c0_i32_7 = arith.constant 0 : i32
    %c0_i32_8 = arith.constant 0 : i32
    %6 = tpu.memref_slice %arg2[%c0_i32_6, %c0_i32_7, %c0_i32_8] : memref<2x8x384xf32, #tpu.memory_space<any>> -> memref<2x8x128xf32, #tpu.memory_space<any>>
    %7 = tpu.memref_slice %arg3[%c0_i32_5] : memref<2x!tpu.dma_semaphore, #tpu.memory_space<semaphore_mem>> -> memref<1x!tpu.dma_semaphore, #tpu.memory_space<semaphore_mem>>
    %8 = tpu.memref_squeeze %7 : memref<1x!tpu.dma_semaphore, #tpu.memory_space<semaphore_mem>> -> memref<!tpu.dma_semaphore, #tpu.memory_space<semaphore_mem>>
    tpu.wait_dma2 semaphore(%8 : memref<!tpu.dma_semaphore, #tpu.memory_space<semaphore_mem>>) src(%arg0 : memref<2x8x128xf32, #tpu.memory_space<any>>) dst(%6 : memref<2x8x128xf32, #tpu.memory_space<any>>)
    %c1_i32_9 = arith.constant 1 : i32
    %c0_i32_10 = arith.constant 0 : i32
    %c0_i32_11 = arith.constant 0 : i32
    %c128_i32_12 = arith.constant 128 : i32
    %9 = tpu.memref_slice %arg2[%c0_i32_10, %c0_i32_11, %c128_i32_12] : memref<2x8x384xf32, #tpu.memory_space<any>> -> memref<2x8x256xf32, #tpu.memory_space<any>>
    %10 = tpu.memref_slice %arg3[%c1_i32_9] : memref<2x!tpu.dma_semaphore, #tpu.memory_space<semaphore_mem>> -> memref<1x!tpu.dma_semaphore, #tpu.memory_space<semaphore_mem>>
    %11 = tpu.memref_squeeze %10 : memref<1x!tpu.dma_semaphore, #tpu.memory_space<semaphore_mem>> -> memref<!tpu.dma_semaphore, #tpu.memory_space<semaphore_mem>>
    tpu.wait_dma2 semaphore(%11 : memref<!tpu.dma_semaphore, #tpu.memory_space<semaphore_mem>>) src(%arg1 : memref<2x8x256xf32, #tpu.memory_space<any>>) dst(%9 : memref<2x8x256xf32, #tpu.memory_space<any>>)
    return
  }
}

</mosaic_0001>

<bundles_post_ra>
// kernel: tpu_custom_call.1
= control target key start
LH: loop header
LB: loop body
LE: loop exit
PB: predicated region body
PF: predicated region fallthrough
CT: control target
= control target key end

     0   :  { %s84_s9 = smov 128   ;;  %s85_s10 = smov 384   ;;  %s121_s0 = inlined_call_operand.hbm [shape: f32[2,8,128], index: 0, kind: input, shape index: {}]   ;;  %s122_s1 = inlined_call_operand.hbm [shape: f32[2,8,256], index: 1, kind: input, shape index: {}]   ;;  %s123_s2 = inlined_call_operand.hbm [shape: f32[2,8,384], index: 2, kind: output, shape index: {}]  }
   0x1   :  { %19 = sst [smem:[#allocation4]] %s84_s9  ;;  %s86_s11 = smov 8  }
   0x2   :  { %21 = sst [smem:[#allocation4 + $0x1]] %s85_s10  ;;  %s87_s12 = smov [#allocation2]  }
   0x3   :  { %23 = sst [smem:[#allocation4 + $0x2]] %s86_s11  ;;  %s88_s13 = smov [#allocation3]  }
   0x4   :  { %s89_s14 = smov 0   ;;  %s90_s19 = smov 256  }
   0x5   :  { %25 = dma.general %s121_s0, 256, %s123_s2, %s87_s12, %s88_s13, [#allocation4], %s89_s14, 0  }
   0x6   :  { %40 = sst [smem:[#allocation6]] %s90_s19  ;;  %s26_s22 = scalar_lea.hbm %s123_s2, 128 }
   0x7   :  { %42 = sst [smem:[#allocation6 + $0x1]] %s85_s10  ;;  %s91_s23 = smov 16  }
   0x8   :  { %44 = sst [smem:[#allocation6 + $0x2]] %s91_s23  ;;  %s92_s24 = smov [#allocation2 + $0x1]  }
   0x9   :  { %s93_s25 = smov [#allocation5]  }
   0xa   :  { %46 = dma.general %s122_s1, 512, %s26_s22, %s92_s24, %s93_s25, [#allocation6], %s89_s14, 0  }
   0xb   :  { %80 = dma.done.wait [#allocation2], 256 }
   0xc   :  { %81 = vsyncadd [#allocation2], 4294967040 }
   0xd   :  { %82 = dma.done.wait [#allocation2 + $0x1], 512 }
   0xe   :  { %83 = vsyncadd [#allocation2 + $0x1], 4294966784 }
   0xf   :  { %55 = vsyncmov [#allocation2] }
  0x12   :  { %s56_s0 = vpop.sfrf %55 }
  0x13   :  { %p68_p0 = scmp.ne.s32.totalorder %s56_s0, 0 }
  0x15   :  { %60 = shalt.err (%p68_p0)  }
  0x16   :  { %62 = vsyncmov [#allocation2 + $0x1] }
  0x19   :  { %s63_s28 = vpop.sfrf %62 }
  0x1a   :  { %p69_p1 = scmp.ne.s32.totalorder %s63_s28, 0 }
  0x1c   :  { %67 = shalt.err (%p69_p1)  }

</bundles_post_ra>
